<compile_context>
chip_gen: v6e
topology: v6e:2x2x1
jax: 0.10.0
libtpu: 0.0.40
codegen_flags: <defaults>
</compile_context>

<pallas_src>
import functools

import jax
import jax.numpy as jnp
from jax.experimental import pallas as pl
from jax.experimental.pallas import tpu as pltpu

INPUT_SIZE = 12
DIM_HIDDEN = 32
N_HIDDEN_LAYERS = 3
BATCH = 8
IS_BIAS = True          # hidden-layer bias flag (input/output layers always bias=False)
MAX_TILE_B = 512        # batch tile; small enough for v7x's 64 MiB VMEM with headroom


def _mlp_kernel(x_ref, p_ref, o_ref, *, input_size, dim_hidden, n_hidden):
    # x_ref : (tile_b, input_size)                f32
    # p_ref : (total_rows, dim_hidden)            f32   packed parameters:
    #           rows [0, input_size)                          -> W01 = W_in.T @ W_hid[0].T
    #           rows [input_size + (i-1)*H, ... + H), i=1..N-1 -> W_hid[i].T
    #           next N rows                                    -> b_hid (N, H)
    #           last row                                       -> w_out (1, H)
    # o_ref : (tile_b, 1)                         f32
    H = dim_hidden
    w_rows_end = input_size + (n_hidden - 1) * H
    b_row0 = w_rows_end
    out_row = b_row0 + n_hidden

    x = x_ref[...]                                   # (tile_b, input_size)

    # Layer 0 (input layer folded into hidden layer 0).
    w01 = p_ref[0:input_size, :]                     # (input_size, H)
    b0 = p_ref[b_row0:b_row0 + 1, :]                 # (1, H) -> broadcasts over batch
    h = jnp.tanh(jnp.dot(x, w01, preferred_element_type=jnp.float32) + b0)

    # Remaining hidden layers (static, tiny trip count -> fully unrolled).
    for i in range(1, n_hidden):
        r = input_size + (i - 1) * H
        w_i = p_ref[r:r + H, :]                      # (H, H)
        b_i = p_ref[b_row0 + i:b_row0 + i + 1, :]    # (1, H)
        h = jnp.tanh(jnp.dot(h, w_i, preferred_element_type=jnp.float32) + b_i)

    # Output layer: 1-column matmul replaced by VPU multiply + lane reduction.
    w_out_row = p_ref[out_row:out_row + 1, :]        # (1, H)
    o_ref[...] = jnp.sum(h * w_out_row, axis=-1, keepdims=True)


def _pack_params(w_in, w_hid, b_hid, w_out):
    """Fold the input layer into hidden layer 0 and pack everything into one
    (rows, dim_hidden) f32 buffer.  w_* are in PyTorch (out, in) layout."""
    n_hidden = w_hid.shape[0]
    w01 = jnp.dot(w_in.T, w_hid[0].T,
                  preferred_element_type=jnp.float32)          # (input_size, H)
    parts = [w01]
    for i in range(1, n_hidden):
        parts.append(w_hid[i].T)                               # (H, H) each
    parts.append(b_hid)                                        # (N, H)
    parts.append(w_out)                                        # (1, H) -- out dim is 1
    return jnp.concatenate(parts, axis=0).astype(jnp.float32)


@jax.jit
def mlp_forward(x, w_in, w_hid, b_hid, w_out):
    """x: (input_size, batch). Weights in PyTorch (out, in) layout. Returns (batch, 1)."""
    input_size, batch = x.shape
    dim_hidden = w_in.shape[0]
    n_hidden = w_hid.shape[0]

    x_t = jnp.transpose(x).astype(jnp.float32)        # (batch, input_size)
    params = _pack_params(w_in, w_hid, b_hid, w_out)  # (total_rows, H)
    total_rows = params.shape[0]

    # Batch tiling: single block for small batches; otherwise 8-aligned tiles
    # over a "parallel" grid axis (shards across v7x's two TensorCores).
    if batch <= MAX_TILE_B:
        tile_b = batch
        padded_batch = batch
    else:
        tile_b = MAX_TILE_B
        padded_batch = pl.cdiv(batch, tile_b) * tile_b
        if padded_batch != batch:
            x_t = jnp.pad(x_t, ((0, padded_batch - batch), (0, 0)))
    grid = (padded_batch // tile_b,)

    kernel = functools.partial(
        _mlp_kernel,
        input_size=input_size,
        dim_hidden=dim_hidden,
        n_hidden=n_hidden,
    )

    out = pl.pallas_call(
        kernel,
        out_shape=jax.ShapeDtypeStruct((padded_batch, 1), jnp.float32),
        grid=grid,
        in_specs=[
            pl.BlockSpec((tile_b, input_size), lambda b: (b, 0)),
            pl.BlockSpec((total_rows, dim_hidden), lambda b: (0, 0)),
        ],
        out_specs=pl.BlockSpec((tile_b, 1), lambda b: (b, 0)),
        compiler_params=pltpu.CompilerParams(
            dimension_semantics=("parallel",),
        ),
    )(x_t, params)

    return out[:batch]


def _reference(x, w_in, w_hid, b_hid, w_out):
    h = x.T @ w_in.T
    for i in range(w_hid.shape[0]):
        h = jnp.tanh(h @ w_hid[i].T + b_hid[i])
    return h @ w_out.T


if __name__ == "__main__":
    key = jax.random.PRNGKey(0)
    kx, k_in, k_hid, k_bh, k_out = jax.random.split(key, 5)

    # Deterministic synthetic parameters (PyTorch nn.Linear weight layout: (out, in)).
    x = jax.random.normal(kx, (INPUT_SIZE, BATCH), dtype=jnp.float32)
    w_in = jax.random.normal(k_in, (DIM_HIDDEN, INPUT_SIZE), dtype=jnp.float32) * 0.2
    w_hid = jax.random.normal(
        k_hid, (N_HIDDEN_LAYERS, DIM_HIDDEN, DIM_HIDDEN), dtype=jnp.float32
    ) * 0.2
    if IS_BIAS:
        b_hid = jax.random.normal(
            k_bh, (N_HIDDEN_LAYERS, DIM_HIDDEN), dtype=jnp.float32
        ) * 0.1
    else:
        b_hid = jnp.zeros((N_HIDDEN_LAYERS, DIM_HIDDEN), dtype=jnp.float32)
    w_out = jax.random.normal(k_out, (1, DIM_HIDDEN), dtype=jnp.float32) * 0.2

    out = mlp_forward(x, w_in, w_hid, b_hid, w_out)
    out = jax.block_until_ready(out)

    ref = _reference(x, w_in, w_hid, b_hid, w_out)
    assert out.shape == (BATCH, 1), out.shape
    # Folding W_in into the first hidden weight changes f32 rounding slightly.
    assert jnp.allclose(out, ref, atol=1e-4, rtol=1e-4), "mismatch vs reference"

    print("KERNEL_OK")
</pallas_src>

<mosaic_0001>
module attributes {stable_mosaic.version = 11 : i64} {
  func.func @_mlp_kernel(%arg0: i32, %arg1: memref<8x12xf32, #tpu.memory_space<vmem>>, %arg2: memref<80x32xf32, #tpu.memory_space<vmem>>, %arg3: memref<8x1xf32, #tpu.memory_space<vmem>>) attributes {dimension_semantics = [#tpu.dimension_semantics<parallel>], iteration_bounds = array<i64: 1>, scalar_prefetch = 0 : i64, scratch_operands = 0 : i64, tpu.core_type = #tpu.core_type<tc>, window_params = [{transform_indices = @transform_0, window_bounds = array<i64: 8, 12>}, {pipeline_mode = #tpu.pipeline_mode<synchronous>, transform_indices = @transform_1, window_bounds = array<i64: 80, 32>}, {transform_indices = @transform_2, window_bounds = array<i64: 8, 1>}]} {
    %c0 = arith.constant 0 : index
    %c0_0 = arith.constant 0 : index
    %0 = vector.load %arg1[%c0, %c0_0] : memref<8x12xf32, #tpu.memory_space<vmem>>, vector<8x12xf32>
    %c0_1 = arith.constant 0 : index
    %c0_2 = arith.constant 0 : index
    %1 = vector.load %arg2[%c0_1, %c0_2] : memref<80x32xf32, #tpu.memory_space<vmem>>, vector<12x32xf32>
    %c76 = arith.constant 76 : index
    %c0_3 = arith.constant 0 : index
    %2 = vector.load %arg2[%c76, %c0_3] : memref<80x32xf32, #tpu.memory_space<vmem>>, vector<1x32xf32>
    %cst = arith.constant dense<0.000000e+00> : vector<8x32xf32>
    %3 = tpu.matmul %0, %1, %cst {dimension_numbers = #tpu.dot_dimension_numbers<[1], [0], [0], [1], [0, 0, 1, 1], [], []>} : vector<8x12xf32>, vector<12x32xf32>, vector<8x32xf32> -> vector<8x32xf32>
    %4 = vector.broadcast %2 : vector<1x32xf32> to vector<8x32xf32>
    %5 = arith.addf %3, %4 : vector<8x32xf32>
    %6 = math.tanh %5 : vector<8x32xf32>
    %c12 = arith.constant 12 : index
    %c0_4 = arith.constant 0 : index
    %7 = vector.load %arg2[%c12, %c0_4] : memref<80x32xf32, #tpu.memory_space<vmem>>, vector<32x32xf32>
    %c77 = arith.constant 77 : index
    %c0_5 = arith.constant 0 : index
    %8 = vector.load %arg2[%c77, %c0_5] : memref<80x32xf32, #tpu.memory_space<vmem>>, vector<1x32xf32>
    %cst_6 = arith.constant dense<0.000000e+00> : vector<8x32xf32>
    %9 = tpu.matmul %6, %7, %cst_6 {dimension_numbers = #tpu.dot_dimension_numbers<[1], [0], [0], [1], [0, 0, 1, 1], [], []>} : vector<8x32xf32>, vector<32x32xf32>, vector<8x32xf32> -> vector<8x32xf32>
    %10 = vector.broadcast %8 : vector<1x32xf32> to vector<8x32xf32>
    %11 = arith.addf %9, %10 : vector<8x32xf32>
    %12 = math.tanh %11 : vector<8x32xf32>
    %c44 = arith.constant 44 : index
    %c0_7 = arith.constant 0 : index
    %13 = vector.load %arg2[%c44, %c0_7] : memref<80x32xf32, #tpu.memory_space<vmem>>, vector<32x32xf32>
    %c78 = arith.constant 78 : index
    %c0_8 = arith.constant 0 : index
    %14 = vector.load %arg2[%c78, %c0_8] : memref<80x32xf32, #tpu.memory_space<vmem>>, vector<1x32xf32>
    %cst_9 = arith.constant dense<0.000000e+00> : vector<8x32xf32>
    %15 = tpu.matmul %12, %13, %cst_9 {dimension_numbers = #tpu.dot_dimension_numbers<[1], [0], [0], [1], [0, 0, 1, 1], [], []>} : vector<8x32xf32>, vector<32x32xf32>, vector<8x32xf32> -> vector<8x32xf32>
    %16 = vector.broadcast %14 : vector<1x32xf32> to vector<8x32xf32>
    %17 = arith.addf %15, %16 : vector<8x32xf32>
    %18 = math.tanh %17 : vector<8x32xf32>
    %c79 = arith.constant 79 : index
    %c0_10 = arith.constant 0 : index
    %19 = vector.load %arg2[%c79, %c0_10] : memref<80x32xf32, #tpu.memory_space<vmem>>, vector<1x32xf32>
    %20 = vector.broadcast %19 : vector<1x32xf32> to vector<8x32xf32>
    %21 = arith.mulf %18, %20 : vector<8x32xf32>
    %cst_11 = arith.constant dense<0.000000e+00> : vector<8xf32>
    %22 = vector.multi_reduction <add>, %21, %cst_11 [1] : vector<8x32xf32> to vector<8xf32>
    %23 = vector.shape_cast %22 : vector<8xf32> to vector<8x1xf32>
    %c0_12 = arith.constant 0 : index
    %c0_13 = arith.constant 0 : index
    %24 = vector.load %arg3[%c0_12, %c0_13] : memref<8x1xf32, #tpu.memory_space<vmem>>, vector<8x1xf32>
    tpu.vector_store %arg3[%c0_12, %c0_13], %23 {strides = array<i32>} : memref<8x1xf32, #tpu.memory_space<vmem>>, vector<8x1xf32>,
    return
  }
  func.func @transform_0(%arg0: i32) -> (i32, i32) {
    %c0_i32 = arith.constant 0 : i32
    %c0_i32_0 = arith.constant 0 : i32
    return %arg0, %c0_i32 : i32, i32
  }
  func.func @transform_1(%arg0: i32) -> (i32, i32) {
    %c0_i32 = arith.constant 0 : i32
    %c0_i32_0 = arith.constant 0 : i32
    %c0_i32_1 = arith.constant 0 : i32
    return %c0_i32, %c0_i32_0 : i32, i32
  }
  func.func @transform_2(%arg0: i32) -> (i32, i32) {
    %c0_i32 = arith.constant 0 : i32
    %c0_i32_0 = arith.constant 0 : i32
    return %arg0, %c0_i32 : i32, i32
  }
}

</mosaic_0001>

<bundles_post_ra>
// kernel: mlp_forward.1
= control target key start
LH: loop header
LB: loop body
LE: loop exit
PB: predicated region body
PF: predicated region fallthrough
CT: control target
= control target key end

     0   :  { %vm23_vm0 = vcmask 1043456   ;;  %v338_v0 = vmov 0.0   ;;  %vm339_vm1 = vmmov 0   ;;  %vm19_vm2 = vcmask 97280   ;;  %s406_s1 = inlined_call_operand.vmem [shape: f32[80,32], index: 1, kind: input, shape index: {}]   ;;  %s407_s0 = inlined_call_operand.vmem [shape: f32[8,12], index: 0, kind: input, shape index: {}]   ;;  %s408_s2 = inlined_call_operand.vmem [shape: f32[8,1], index: 2, kind: output, shape index: {}]  }
   0x1   :  { %301 = vmatprep.subr.mxu0 %v338_v0  ;;  %v13_v1 = vld [vmem:[%s406_s1 + $0x8] sm:$0xf]  ;;  %v12_v2 = vld [vmem:[%s406_s1] sm:$0xff]  ;;  %305 = vmatprep.mubr.msk.f32.mxu0 %vm339_vm1, %v338_v0  ;;  %v99_v6 = vld [vmem:[%s406_s1 + $0x14] sm:$0xff]  ;;  %vm107_vm3 = vcmask 261120   ;;  %vm274_vm4 = vcmask 7168  }
   0x2   :  { %302 = vmatpush3.msk.msra.mxu0 %vm23_vm0, %v13_v1  ;;  %v11_v3 = vld [vmem:[%s407_s0] sm:$0xff]  ;;  %308 = vmatprep.subr.mxu1 %v338_v0  ;;  %v98_v7 = vld [vmem:[%s406_s1 + $0xc] sm:$0xff]  ;;  %v183_v15 = vld [vmem:[%s406_s1 + $0x34] sm:$0xff] }
   0x3   :  { %303 = vmatprep.subr.mxu0 %v338_v0  ;;  %316 = vmatprep.mubr.msk.f32.mxu1 %vm339_vm1, %v338_v0  ;;  %v101_v4 = vld [vmem:[%s406_s1 + $0x24] sm:$0xff]  ;;  %v100_v5 = vld [vmem:[%s406_s1 + $0x1c] sm:$0xff]  ;;  %v280_v8 = vld [vmem:[%s406_s1 + $0x4c] ss:$0 sm:$0xff] }
   0x4   :  { %304 = vmatpush3.msra.mxu0 %v12_v2  ;;  %309 = vmatpush3.msra.mxu1 %v101_v4  ;;  %v185_v13 = vld [vmem:[%s406_s1 + $0x44] sm:$0xff]  ;;  %v184_v14 = vld [vmem:[%s406_s1 + $0x3c] sm:$0xff]  ;;  %v182_v16 = vld [vmem:[%s406_s1 + $0x2c] sm:$0xff] }
   0x5   :  { %306 = vmatmul.mubr.msk.f32.vlgmr.msra.gmra.mxu0 %vm19_vm2, %v11_v3  ;;  %319 = vmatprep.subr.mxu0 %v338_v0  ;;  %v283_v17 = vld [vmem:[%s406_s1 + $0x4d] ss:$0 sm:$0xff]  ;;  %v285_v22 = vld [vmem:[%s406_s1 + $0x4e] ss:$0 sm:$0xff]  ;;  %v287_v26 = vld [vmem:[%s406_s1 + $0x4f] ss:$0 sm:$0xff] }
   0x6   :  { %327 = vmatprep.mubr.msk.f32.mxu0 %vm339_vm1, %v338_v0  ;;  %310 = vmatprep.subr.mxu1 %v338_v0 }
   0x7   :  { %311 = vmatpush3.msra.mxu1 %v100_v5  ;;  %320 = vmatpush3.msra.mxu0 %v185_v13 }
   0x8   :  { %312 = vmatprep.subr.mxu1 %v338_v0  ;;  %321 = vmatprep.subr.mxu0 %v338_v0 }
   0x9   :  { %313 = vmatpush3.msra.mxu1 %v99_v6  ;;  %322 = vmatpush3.msra.mxu0 %v184_v14 }
   0xa   :  { %314 = vmatprep.subr.mxu1 %v338_v0  ;;  %323 = vmatprep.subr.mxu0 %v338_v0 }
   0xb   :  { %315 = vmatpush3.msra.mxu1 %v98_v7  ;;  %324 = vmatpush3.msra.mxu0 %v183_v15 }
   0xc   :  { %325 = vmatprep.subr.mxu0 %v338_v0 }
   0xd   :  { %326 = vmatpush3.msra.mxu0 %v182_v16 }
  0xc5   :  { %v93_v9 = vpop.f32.mrf.mxu0 }
  0xc6   :  { %v94_v10 = vadd.f32 %v280_v8, %v93_v9 }
  0xc7   :  { %v307_v11 = vpop.f32.mrf.mxu0 }
  0xc8   :  { %332 = vtanh.f32 %v94_v10 }
  0xd5   :  { %v333_v12 = vpop.eup %332 }
  0xd6   :  { %317 = vmatmul.mubr.msk.f32.vlgmr.msra.gmra.mxu1 %vm107_vm3, %v333_v12 }
 0x196   :  { %v177_v18 = vpop.f32.mrf.mxu1 }
 0x197   :  { %v178_v19 = vadd.f32 %v283_v17, %v177_v18 }
 0x198   :  { %v318_v20 = vpop.f32.mrf.mxu1 }
 0x199   :  { %334 = vtanh.f32 %v178_v19 }
 0x1a6   :  { %v335_v21 = vpop.eup %334 }
 0x1a7   :  { %328 = vmatmul.mubr.msk.f32.vlgmr.msra.gmra.mxu0 %vm107_vm3, %v335_v21 }
 0x267   :  { %v260_v23 = vpop.f32.mrf.mxu0 }
 0x268   :  { %v261_v24 = vadd.f32 %v285_v22, %v260_v23 }
 0x269   :  { %v329_v25 = vpop.f32.mrf.mxu0 }
 0x26a   :  { %336 = vtanh.f32 %v261_v24 }
 0x277   :  { %v337_v27 = vpop.eup %336 }
 0x278   :  { %v270_v28 = vmul.f32 %v337_v27, %v287_v26 }
 0x27a   :  { %v271_v29 = vsel %vm107_vm3, %v270_v28, 0.0 }
 0x27b   :  { %272 = vadd.xlane.f32.xlu0 %v271_v29 }
 0x304   :  { %v273_v30 = vpop.xlane.xlu0 %272 }
 0x305   :  { %275 = vst.msk [vmem:[%s408_s2] sm:$0xff] %vm274_vm4, %v273_v30 }

</bundles_post_ra>
